<compile_context>
chip_gen: v7x
topology: tpu7x:2x2x1
jax: 0.10.0
libtpu: 0.0.40
codegen_flags: <defaults>
</compile_context>

<pallas_src>
import jax
import jax.numpy as jnp
from jax import lax
from jax.experimental import pallas as pl
from jax.experimental.pallas import tpu as pltpu


def _round_up(x, m):
    return ((x + m - 1) // m) * m


def _make_counts_matmul_kernel(vocab_size, vt, mask_tail):
    """counts (Bt, Vt) @ table (Vt, Dt) accumulated into resident f32 out."""

    def kernel(counts_ref, table_ref, out_ref):
        v = pl.program_id(2)

        @pl.when(v == 0)
        def _():
            out_ref[...] = jnp.zeros_like(out_ref)

        tbl = table_ref[...]
        if mask_tail:
            # The table is NOT padded in HBM, so rows >= vocab_size of the
            # ragged last vocab tile hold garbage.  Zero them so zero-count
            # columns cannot inject NaNs through the matmul.
            rows = lax.broadcasted_iota(jnp.int32, tbl.shape, 0) + v * vt
            tbl = jnp.where(rows < vocab_size, tbl, jnp.zeros_like(tbl))

        out_ref[...] += jnp.dot(counts_ref[...], tbl,
                                preferred_element_type=jnp.float32)

    return kernel


def just_embedding_encoder(input_ids, embedding_table, *,
                           bt_max=256, vt_max=2048,
                           vmem_budget_bytes=32 * 1024 * 1024):
    """input_ids (B, S) int, embedding_table (V, D) float -> (B, D)."""
    assert vt_max % 128 == 0, "vt_max must be a multiple of 128 (lane width)"
    assert bt_max % 8 == 0, "bt_max must be a multiple of 8 (sublane width)"

    # TODO(synk): when V*D >> B*S*D (huge vocab, few tokens) a scalar-prefetch
    # gather kernel (ids in SMEM, per-row DMA) reads only B*S*D from HBM and
    # beats this counts@table formulation; not implemented here.

    B, S = input_ids.shape
    V, D = embedding_table.shape
    tbl_dtype = embedding_table.dtype

    # Matmul-LHS dtype: bf16 table -> bf16 counts (exact integers for S<=256),
    # otherwise f32.  Accumulation is always f32 via preferred_element_type.
    lhs_dtype = jnp.bfloat16 if tbl_dtype == jnp.bfloat16 else jnp.float32

    # ---- tile sizes --------------------------------------------------------
    # Batch tile: as large as possible (MXU M occupancy; one full-table HBM
    # stream per batch tile), multiple of 8 sublanes.
    Bt = min(_round_up(B, 8), bt_max)
    Bp = _round_up(B, Bt)

    # D tile: lane-dense tiles when D is a multiple of 128 (also gives v7x a
    # second parallel grid axis); otherwise one full-extent block.
    if D % 128 == 0:
        Dt = 512 if D % 512 == 0 else (256 if D % 256 == 0 else 128)
        num_d = D // Dt
    else:
        Dt = D
        num_d = 1

    # Vocab (reduction) tile derived from a VMEM budget:
    #   2x table tile + 2x counts tile (double-buffered) + resident output.
    tbl_isz = jnp.dtype(tbl_dtype).itemsize
    lhs_isz = jnp.dtype(lhs_dtype).itemsize
    out_bytes = 2 * Bt * Dt * 4
    avail = max(vmem_budget_bytes - out_bytes - (2 << 20), 1 << 20)
    per_vocab_row = 2 * (Dt * tbl_isz + Bt * lhs_isz)
    vt_cap = max(128, (avail // per_vocab_row) // 128 * 128)
    Vt = min(vt_max, vt_cap)
    if V <= Vt:
        Vt = V                       # single full-extent vocab tile, no mask
    num_v = pl.cdiv(V, Vt)
    Vp = num_v * Vt
    mask_tail = (V % Vt) != 0        # ragged last vocab tile -> in-kernel mask

    vmem_need = (2 * Vt * Dt * tbl_isz + 2 * Bt * Vt * lhs_isz + out_bytes)
    vmem_limit = int(min(max(vmem_need + (4 << 20), 16 << 20), 48 << 20))

    # ---- counts: O(B*S) scatter-add histogram of the token ids -------------
    ids = input_ids.astype(jnp.int32)
    counts = jnp.zeros((Bp, Vp), lhs_dtype)
    counts = counts.at[jnp.arange(B)[:, None], ids].add(
        jnp.ones((), lhs_dtype))     # OOB ids are dropped; padded rows stay 0

    grid = (Bp // Bt, num_d, num_v)  # batch / D parallel, vocab reduction last

    out = pl.pallas_call(
        _make_counts_matmul_kernel(V, Vt, mask_tail),
        out_shape=jax.ShapeDtypeStruct((Bp, D), jnp.float32),
        grid_spec=pltpu.PrefetchScalarGridSpec(
            num_scalar_prefetch=0,
            grid=grid,
            in_specs=[
                pl.BlockSpec((Bt, Vt), lambda i, d, v: (i, v)),   # counts
                pl.BlockSpec((Vt, Dt), lambda i, d, v: (v, d)),   # table tile
            ],
            out_specs=pl.BlockSpec((Bt, Dt), lambda i, d, v: (i, d)),
        ),
        compiler_params=pltpu.CompilerParams(
            dimension_semantics=("parallel", "parallel", "arbitrary"),
            vmem_limit_bytes=vmem_limit,
        ),
    )(counts, embedding_table)

    pooled = out[:B]
    if tbl_dtype != jnp.float32:
        pooled = pooled.astype(tbl_dtype)
    return pooled


def forward(input_ids, params, attention_mask=None, token_type_ids=None,
            output_hidden_states=True):
    # attention_mask / token_type_ids are ignored, matching the PyTorch module.
    pooled = just_embedding_encoder(input_ids, params["embedding"])
    return {"pooler_output": pooled}


if __name__ == "__main__":
    # cfg.input_size (vocab), cfg.embedding_dim
    VOCAB = 32
    EMBED_DIM = 128
    BATCH = 2
    SEQ = 8

    key = jax.random.PRNGKey(0)
    k_emb, k_ids = jax.random.split(key)

    # nn.Embedding default init: N(0, 1)
    embedding_table = jax.random.normal(k_emb, (VOCAB, EMBED_DIM),
                                        dtype=jnp.float32)
    input_ids = jax.random.randint(k_ids, (BATCH, SEQ), 0, VOCAB,
                                   dtype=jnp.int32)

    params = {"embedding": embedding_table}

    out = forward(input_ids, params)
    pooled = jax.block_until_ready(out["pooler_output"])

    # Pure-JAX reference check.
    ref = jnp.take(embedding_table, input_ids, axis=0).sum(axis=1)
    assert pooled.shape == (BATCH, EMBED_DIM)
    assert jnp.allclose(pooled, ref, atol=1e-4, rtol=1e-4)

    print("KERNEL_OK")
</pallas_src>

<mosaic_0001>
module attributes {stable_mosaic.version = 11 : i64} {
  func.func @kernel(%arg0: i32, %arg1: i32, %arg2: i32, %arg3: memref<8x32xf32, #tpu.memory_space<vmem>>, %arg4: memref<32x128xf32, #tpu.memory_space<vmem>>, %arg5: memref<8x128xf32, #tpu.memory_space<vmem>>) attributes {dimension_semantics = [#tpu.dimension_semantics<parallel>, #tpu.dimension_semantics<parallel>, #tpu.dimension_semantics<arbitrary>], iteration_bounds = array<i64: 1, 1, 1>, scalar_prefetch = 0 : i64, scratch_operands = 0 : i64, tpu.core_type = #tpu.core_type<tc>, window_params = [{transform_indices = @transform_0, window_bounds = array<i64: 8, 32>}, {transform_indices = @transform_1, window_bounds = array<i64: 32, 128>}, {transform_indices = @transform_2, window_bounds = array<i64: 8, 128>}]} {
    %c0_i32 = arith.constant 0 : i32
    %0 = arith.cmpi eq, %arg2, %c0_i32 : i32
    %1 = arith.extui %0 : i1 to i32
    %c0_i32_0 = arith.constant 0 : i32
    %2 = arith.cmpi ne, %1, %c0_i32_0 : i32
    scf.if %2 {
      %cst_8 = arith.constant 0.000000e+00 : f32
      %9 = vector.broadcast %cst_8 : f32 to vector<8x128xf32>
      %c0_9 = arith.constant 0 : index
      %c0_10 = arith.constant 0 : index
      %10 = vector.load %arg5[%c0_9, %c0_10] : memref<8x128xf32, #tpu.memory_space<vmem>>, vector<8x128xf32>
      tpu.vector_store %arg5[%c0_9, %c0_10], %9 {strides = array<i32>} : memref<8x128xf32, #tpu.memory_space<vmem>>, vector<8x128xf32>,
    } else {
    }
    %c0 = arith.constant 0 : index
    %c0_1 = arith.constant 0 : index
    %3 = vector.load %arg4[%c0, %c0_1] : memref<32x128xf32, #tpu.memory_space<vmem>>, vector<32x128xf32>
    %c0_2 = arith.constant 0 : index
    %c0_3 = arith.constant 0 : index
    %4 = vector.load %arg5[%c0_2, %c0_3] : memref<8x128xf32, #tpu.memory_space<vmem>>, vector<8x128xf32>
    %c0_4 = arith.constant 0 : index
    %c0_5 = arith.constant 0 : index
    %5 = vector.load %arg3[%c0_4, %c0_5] : memref<8x32xf32, #tpu.memory_space<vmem>>, vector<8x32xf32>
    %cst = arith.constant dense<0.000000e+00> : vector<8x128xf32>
    %6 = tpu.matmul %5, %3, %cst {dimension_numbers = #tpu.dot_dimension_numbers<[1], [0], [0], [1], [0, 0, 1, 1], [], []>} : vector<8x32xf32>, vector<32x128xf32>, vector<8x128xf32> -> vector<8x128xf32>
    %7 = arith.addf %4, %6 : vector<8x128xf32>
    %c0_6 = arith.constant 0 : index
    %c0_7 = arith.constant 0 : index
    %8 = vector.load %arg5[%c0_6, %c0_7] : memref<8x128xf32, #tpu.memory_space<vmem>>, vector<8x128xf32>
    tpu.vector_store %arg5[%c0_6, %c0_7], %7 {strides = array<i32>} : memref<8x128xf32, #tpu.memory_space<vmem>>, vector<8x128xf32>,
    return
  }
  func.func @transform_0(%arg0: i32, %arg1: i32, %arg2: i32) -> (i32, i32) {
    %c0_i32 = arith.constant 0 : i32
    return %arg0, %arg2 : i32, i32
  }
  func.func @transform_1(%arg0: i32, %arg1: i32, %arg2: i32) -> (i32, i32) {
    %c0_i32 = arith.constant 0 : i32
    return %arg2, %arg1 : i32, i32
  }
  func.func @transform_2(%arg0: i32, %arg1: i32, %arg2: i32) -> (i32, i32) {
    %c0_i32 = arith.constant 0 : i32
    return %arg0, %arg1 : i32, i32
  }
}

</mosaic_0001>

<bundles_post_ra>
// kernel: tpu_custom_call.1
= control target key start
LH: loop header
LB: loop body
LE: loop exit
PB: predicated region body
PF: predicated region fallthrough
CT: control target
= control target key end

     0   :  { %7 = vsyncpa [#allocation3], 0  ;;  %s310_s0 = inlined_call_operand.hbm [shape: f32[8,32], index: 0, kind: input, shape index: {}]   ;;  %s311_s1 = inlined_call_operand.hbm [shape: f32[32,128], index: 1, kind: input, shape index: {}]   ;;  %s312_s2 = inlined_call_operand.hbm [shape: f32[8,128], index: 2, kind: output, shape index: {}]  }
   0x1   :  { %8 = vsyncpa [#allocation6], 0 }
   0x2   :  { %9 = vsyncpa [#allocation4], 0  ;;  %s244_s9 = smov [#allocation2]   ;;  %s245_s11 = smov [#allocation5]  }
   0x3   :  { %s16_s10 = sshll.u32 %s244_s9, 4  ;;  %s25_s12 = sshll.u32 %s245_s11, 4  ;;  %s17_s10 = int_to_ptr.vmem [resolvable:$true] %s16_s10  ;;  %s267_s12 = int_to_ptr.vmem [resolvable:$true] %s25_s12 }
   0x4   :  { %s172_s15 = scalar_lea.hbm %s310_s0, 128 }
   0x5   :  { %p173_p0 = scmp.ne.s32.totalorder %s310_s0, %s172_s15  ;;  %p176_p1 = scmp.lt.u32.totalorder %s172_s15, %s310_s0 }
   0x7   :  { %p178_p2 = pnand %p176_p1, %p173_p0 }
   0x9   :  { %181 = shalt.err (!%p178_p2)
}
   0xa   :  { %s182_s20 = scalar_lea.vmem %s17_s10, 128  ;;  %p187_p4 = scmp.lt.s32.totalorder %s17_s10, %s17_s10 }
   0xb   :  { %p183_p3 = scmp.ne.s32.totalorder %s17_s10, %s182_s20  ;;  %p188_p5 = scmp.lt.s32.totalorder %s182_s20, %s182_s20 }
   0xd   :  { %p189_p6 = por %p188_p5, %p187_p4 }
   0xf   :  { %p190_p7 = pnand %p189_p6, %p183_p3 }
  0x11   :  { %193 = shalt.err (!%p190_p7)
}
  0x12   :  { %19 = dma.hbm_to_vmem [thread:$0]  %s310_s0, 128, %s17_s10, [#allocation3]  }
  0x13   :  { %s194_s25 = scalar_lea.hbm %s311_s1, 512 }
  0x14   :  { %p195_p8 = scmp.ne.s32.totalorder %s311_s1, %s194_s25  ;;  %p198_p9 = scmp.lt.u32.totalorder %s194_s25, %s311_s1 }
  0x16   :  { %p200_p10 = pnand %p198_p9, %p195_p8 }
  0x18   :  { %203 = shalt.err (!%p200_p10)
}
  0x19   :  { %s204_s30 = scalar_lea.vmem %s267_s12, 512  ;;  %p209_p12 = scmp.lt.s32.totalorder %s267_s12, %s267_s12 }
  0x1a   :  { %p205_p11 = scmp.ne.s32.totalorder %s267_s12, %s204_s30  ;;  %p210_p13 = scmp.lt.s32.totalorder %s204_s30, %s204_s30 }
  0x1c   :  { %p211_p0 = por %p210_p13, %p209_p12 }
  0x1e   :  { %p212_p1 = pnand %p211_p0, %p205_p11 }
  0x20   :  { %215 = shalt.err (!%p212_p1)
}
  0x21   :  { %s246_s0 = smov 128   ;;  %s247_s3 = smov 8  }
  0x22   :  { %31 = dma.hbm_to_vmem [thread:$0]  %s311_s1, 512, %s267_s12, [#allocation6], %s246_s0, %s246_s0, %s247_s3  }
  0x23   :  { %238 = dma.done.wait [#allocation3], 128  }
  0x24   :  { %239 = vsyncadd [#allocation3], 4294967168 }
  0x25   :  { %240 = dma.done.wait [#allocation6], 512  }
  0x26   :  { %241 = vsyncadd [#allocation6], 4294966784  ;;  %v248_v0 = vmov 0.0|0.0   ;;  %vm249_vm0 = vmmov 0   ;;  %v250_v1 = vmov 0.0   ;;  %v43_v2 = vld [vmem:[#allocation5] sm:$0xff] }
  0x27   :  { %158 = vmatprep.subr.bf16.mxu0 %v248_v0  ;;  %155 = vmatprep.mubr.msk.f32.mxu0 %vm249_vm0, %v250_v1  ;;  %v44_v3 = vld [vmem:[#allocation5 + $0x8] sm:$0xff]  ;;  %v45_v4 = vld [vmem:[#allocation5 + $0x10] sm:$0xff]  ;;  %v46_v6 = vld [vmem:[#allocation5 + $0x18] sm:$0xff]  ;;  %vm49_vm1 = vcmask 261120   ;;  %s251_s1 = smov [#allocation7]  }
  0x28   :  { %v159_v5 = vpack.c.bf16 %v44_v3, %v43_v2  ;;  %v162_v7 = vpack.c.bf16 %v46_v6, %v45_v4  ;;  %v48_v8 = vld [vmem:[#allocation2] sm:$0xff]  ;;  %s131_s6 = sshll.u32 %s251_s1, 4  ;;  %s132_s6 = int_to_ptr.vmem [resolvable:$true] %s131_s6 }
  0x29   :  { %s216_s7 = scalar_lea.vmem %s132_s6, 128  ;;  %p221_p3 = scmp.lt.s32.totalorder %s132_s6, %s132_s6 }
  0x2a   :  { %160 = vmatpush3.bf16.msra.mxu0 %v159_v5  ;;  %p217_p2 = scmp.ne.s32.totalorder %s132_s6, %s216_s7  ;;  %p222_p4 = scmp.lt.s32.totalorder %s216_s7, %s216_s7 }
  0x2b   :  { %161 = vmatprep.subr.bf16.mxu0 %v248_v0 }
  0x2c   :  { %p223_p5 = por %p222_p4, %p221_p3 }
  0x2e   :  { %163 = vmatpush3.bf16.msra.mxu0 %v162_v7  ;;  %p224_p6 = pnand %p223_p5, %p217_p2 }
  0x31   :  { %156 = vmatmul.mubr.msk.f32.vlgmr.msra.gmra.mrb[0].mxu0 %vm49_vm1, %v48_v8 }
 0x104   :  { %v119_v9 = vpop.f32.mrb[0].mxu0 }
 0x105   :  { %v157_v10 = vpop.f32.mrb[1].mxu0  ;;  %124 = vst [vmem:[#allocation7] sm:$0xff] %v119_v9 }
 0x106   :  { %227 = shalt.err (!%p224_p6)
}
 0x107   :  { %s228_s10 = scalar_lea.hbm %s312_s2, 128 }
 0x108   :  { %p229_p7 = scmp.ne.s32.totalorder %s312_s2, %s228_s10  ;;  %p232_p8 = scmp.lt.u32.totalorder %s228_s10, %s312_s2 }
 0x10a   :  { %p234_p9 = pnand %p232_p8, %p229_p7 }
 0x10c   :  { %237 = shalt.err (!%p234_p9)
}
 0x10d   :  { %134 = dma.vmem_to_hbm [thread:$0]  %s132_s6, 128, %s312_s2, [#allocation4]  }
 0x10e   :  { %242 = dma.done.wait [#allocation4], 128  }
 0x10f   :  { %243 = vsyncadd [#allocation4], 4294967168 }
 0x110   :  { %138 = vsyncpa [#allocation3], 1 }
 0x111   :  { %139 = vsyncpa [#allocation6], 1 }
 0x112   :  { %140 = vsyncpa [#allocation4], 1 }

</bundles_post_ra>
